<compile_context>
chip_gen: v7x
topology: tpu7x:2x2x1
jax: 0.10.0
libtpu: 0.0.40
codegen_flags: <defaults>
</compile_context>

<pallas_src>
import numpy as np
import jax
import jax.numpy as jnp
from jax.experimental import pallas as pl
from jax.experimental.pallas import tpu as pltpu


# ---------------------- PyTorch-exact spatial operators ----------------------

def adaptive_pool_matrix(out_size, in_size):
    """Row-stochastic matrix reproducing torch adaptive_avg_pool1d windows."""
    m = np.zeros((out_size, in_size), dtype=np.float32)
    for i in range(out_size):
        start = (i * in_size) // out_size
        end = -((-(i + 1) * in_size) // out_size)  # ceil((i+1)*in/out)
        m[i, start:end] = 1.0 / (end - start)
    return m


def bilinear_upsample_matrix(out_size, in_size):
    """Per-axis weights of F.interpolate(mode='bilinear', align_corners=False)."""
    m = np.zeros((out_size, in_size), dtype=np.float32)
    scale = in_size / out_size
    for i in range(out_size):
        src = max((i + 0.5) * scale - 0.5, 0.0)
        i0 = min(int(np.floor(src)), in_size - 1)
        i1 = min(i0 + 1, in_size - 1)
        lam = src - i0
        m[i, i0] += 1.0 - lam
        m[i, i1] += lam
    return m


def pool_upsample_factors(grid_rows, H, W):
    """Exact low-rank factors of pool+upsample on the row-major flat HW axis.

    Returns P^T (HW, G) and U^T (G, HW) with K = U @ P = the previous dense
    (HW, HW) Kronecker smoothing operator; G = gh*gw <= 64.
    """
    gh = grid_rows
    gw = grid_rows * W // H          # same grid formula as the PyTorch module
    if gh < 1 or gw < 1:
        # PyTorch's adaptive_avg_pool2d fails for a 0-sized grid as well.
        raise ValueError("pool grid collapsed to zero for this aspect ratio")
    P = np.kron(adaptive_pool_matrix(gh, H), adaptive_pool_matrix(gw, W))        # (G, HW)
    U = np.kron(bilinear_upsample_matrix(H, gh), bilinear_upsample_matrix(W, gw))  # (HW, G)
    return P.T.copy(), U.T.copy(), gh * gw


# ------------------------------ Pallas kernel --------------------------------

def _spp_fused_kernel(x_ref, wpT_ref, bp_ref, wbrT_ref, bbr_ref,
                      wbpT_ref, bb_ref, wbbT_ref,
                      p1_ref, u1_ref, p2_ref, u2_ref,
                      p4_ref, u4_ref, p8_ref, u8_ref, o_ref):
    # Per grid step (one image), everything transposed: channels x HW.
    #   x:    (1, C, HW)                 wpT: (C2, C)      bp:  (C2, 1)  f32
    #   wbrT: (4*C8, C2)                 bbr: (4*C8, 1) f32
    #   wbpT: (C4, C2)                   bb:  (C4, 1)  f32
    #   wbbT: (4, C4, C8)                p{g}: (HW, G_g)   u{g}: (G_g, HW)
    #   o:    (1, C4, HW)  f32
    cdt = x_ref.dtype                                                  # bf16 or f32
    f32 = jnp.float32
    x = x_ref[0]                                                       # (C, HW)

    # Projection 1x1 conv (f32 accumulate, f32 bias).
    xp = jnp.dot(wpT_ref[...], x, preferred_element_type=f32) + bp_ref[...]   # (C2, HW)
    xp_c = xp.astype(cdt)

    # All four branch 1x1 convs fused into one matmul.
    z = (jnp.dot(wbrT_ref[...], xp_c, preferred_element_type=f32)
         + bbr_ref[...]).astype(cdt)                                   # (4*C8, HW)

    # Blend conv applied to the xp part of the (never materialized) concat.
    acc = jnp.dot(wbpT_ref[...], xp_c, preferred_element_type=f32) + bb_ref[...]  # (C4, HW)

    c8 = wbbT_ref.shape[2]
    branches = ((p1_ref, u1_ref), (p2_ref, u2_ref), (p4_ref, u4_ref), (p8_ref, u8_ref))
    for g, (pT_ref, uT_ref) in enumerate(branches):
        zg = z[g * c8:(g + 1) * c8]                                    # (C8, HW)
        # adaptive_avg_pool2d on the flat HW (lane) axis: (C8, HW) @ (HW, G).
        pooled = jnp.dot(zg, pT_ref[...], preferred_element_type=f32)  # (C8, G)
        # Blend conv folded in at the pooled resolution: (C4, C8) @ (C8, G).
        small = jnp.dot(wbbT_ref[g], pooled.astype(cdt),
                        preferred_element_type=f32)                    # (C4, G)
        # Bilinear upsample back to HW.  G == 1 (global-pool branch) is a
        # rank-1 outer product: do it on the VPU instead of a K=1 matmul.
        if uT_ref.shape[0] == 1:
            acc = acc + small * uT_ref[...]                            # (C4,1)*(1,HW)
        else:
            acc = acc + jnp.dot(small.astype(cdt), uT_ref[...],
                                preferred_element_type=f32)            # (C4, HW)

    o_ref[0] = acc.astype(o_ref.dtype)


# ------------------------------- Parameters ----------------------------------

def _conv_params(key, cin, cout):
    kw, kb = jax.random.split(key)
    # weight stored as (Cin, Cout): equivalent to torch (Cout, Cin, 1, 1).T
    w = jax.random.normal(kw, (cin, cout), jnp.float32) / np.sqrt(cin)
    b = 0.01 * jax.random.normal(kb, (cout,), jnp.float32)
    return w, b


def init_spp_params(key, input_features):
    C = input_features
    assert C % 8 == 0, "input_features must be divisible by 8 (C//2//4 >= 1)"
    C2 = C // 2
    C8 = C2 // 4
    C4 = C // 4
    ks = jax.random.split(key, 6)
    return {
        "projection": _conv_params(ks[0], C, C2),
        "pcu1": _conv_params(ks[1], C2, C8),
        "pcu2": _conv_params(ks[2], C2, C8),
        "pcu4": _conv_params(ks[3], C2, C8),
        "pcu8": _conv_params(ks[4], C2, C8),
        "blend": _conv_params(ks[5], C, C4),
    }


# ------------------------------ Forward pass ----------------------------------

def spatial_pyramid_pooling(x_nchw, params, *, compute_dtype=jnp.bfloat16):
    B, C, H, W = x_nchw.shape
    HW = H * W
    cdt = compute_dtype

    wp, bp = params["projection"]
    C2 = wp.shape[1]
    branch_names = ("pcu1", "pcu2", "pcu4", "pcu8")
    grid_rows = (1, 2, 4, 8)
    C8 = params["pcu1"][0].shape[1]
    wb, bb = params["blend"]
    C4 = wb.shape[1]

    # --- tiny weight re-layouts (KB-scale, done once by XLA, outside the kernel) ---
    wpT = wp.T.astype(cdt)                                                    # (C2, C)
    wbrT = jnp.concatenate([params[n][0] for n in branch_names], axis=1).T.astype(cdt)  # (4*C8, C2)
    bbr = jnp.concatenate([params[n][1] for n in branch_names], axis=0).reshape(-1, 1)  # (4*C8, 1) f32
    wbpT = wb[:C2].T.astype(cdt)                                              # (C4, C2)
    wbbT = jnp.stack([wb[C2 + g * C8: C2 + (g + 1) * C8].T
                      for g in range(len(grid_rows))]).astype(cdt)            # (4, C4, C8)

    # --- per-branch pool / upsample low-rank operators on the flat HW axis ---
    poolT, upT, gsizes = [], [], []
    for g in grid_rows:
        pT, uT, gsz = pool_upsample_factors(g, H, W)
        poolT.append(jnp.asarray(pT, dtype=cdt))                              # (HW, G)
        upT.append(jnp.asarray(uT, dtype=cdt))                                # (G, HW)
        gsizes.append(gsz)

    # Free reshape of NCHW (no transpose); cast MXU operand to compute dtype.
    x = x_nchw.reshape(B, C, HW).astype(cdt)

    const2 = lambda b: (0, 0)
    const3 = lambda b: (0, 0, 0)
    pu_specs = []
    pu_args = []
    for gsz, pT, uT in zip(gsizes, poolT, upT):
        pu_specs += [pl.BlockSpec((HW, gsz), const2), pl.BlockSpec((gsz, HW), const2)]
        pu_args += [pT, uT]

    out = pl.pallas_call(
        _spp_fused_kernel,
        out_shape=jax.ShapeDtypeStruct((B, C4, HW), jnp.float32),
        grid=(B,),
        in_specs=[
            pl.BlockSpec((1, C, HW), lambda b: (b, 0, 0)),     # x (lane-dense HW)
            pl.BlockSpec((C2, C), const2),                     # projection W^T
            pl.BlockSpec((C2, 1), const2),                     # projection bias
            pl.BlockSpec((4 * C8, C2), const2),                # fused branch W^T
            pl.BlockSpec((4 * C8, 1), const2),                 # fused branch bias
            pl.BlockSpec((C4, C2), const2),                    # blend W^T (xp part)
            pl.BlockSpec((C4, 1), const2),                     # blend bias
            pl.BlockSpec((len(grid_rows), C4, C8), const3),    # blend W^T per branch
        ] + pu_specs,
        out_specs=pl.BlockSpec((1, C4, HW), lambda b: (b, 0, 0)),
        compiler_params=pltpu.CompilerParams(
            dimension_semantics=("parallel",)),
    )(x, wpT, bp.reshape(-1, 1), wbrT, bbr, wbpT, bb.reshape(-1, 1), wbbT, *pu_args)

    return out.reshape(B, C4, H, W)                            # free reshape back to NCHW


# -------------------- Pure-JAX reference (mirrors torch graph) ----------------

def _reference_spp(x_nchw, params):
    hp = jax.lax.Precision.HIGHEST
    B, C, H, W = x_nchw.shape
    wp, bp = params["projection"]
    xp = jnp.einsum("bchw,cd->bdhw", x_nchw, wp, precision=hp) + bp[None, :, None, None]
    feats = [xp]
    for g, name in ((1, "pcu1"), (2, "pcu2"), (4, "pcu4"), (8, "pcu8")):
        gh, gw = g, g * W // H
        ph = jnp.asarray(adaptive_pool_matrix(gh, H))
        pw = jnp.asarray(adaptive_pool_matrix(gw, W))
        uh = jnp.asarray(bilinear_upsample_matrix(H, gh))
        uw = jnp.asarray(bilinear_upsample_matrix(W, gw))
        pooled = jnp.einsum("ph,bchw,qw->bcpq", ph, xp, pw, precision=hp)
        wg, bg = params[name]
        conv = jnp.einsum("bcpq,cd->bdpq", pooled, wg, precision=hp) + bg[None, :, None, None]
        feats.append(jnp.einsum("hp,bdpq,wq->bdhw", uh, conv, uw, precision=hp))
    cat = jnp.concatenate(feats, axis=1)
    wb, bb = params["blend"]
    return jnp.einsum("bchw,cd->bdhw", cat, wb, precision=hp) + bb[None, :, None, None]


# ---------------------------------- Main --------------------------------------

if __name__ == "__main__":
    key = jax.random.PRNGKey(0)
    kx, kp = jax.random.split(key)

    B, C, H, W = 2, 16, 16, 16       # input_features=16 -> C2=8, C8=2, C4=4; HW=256
    x = jax.random.normal(kx, (B, C, H, W), jnp.float32)
    params = init_spp_params(kp, C)

    fwd = jax.jit(spatial_pyramid_pooling, static_argnames=("compute_dtype",))

    # Default (bf16-operand / f32-accumulate) path.
    y = fwd(x, params, compute_dtype=jnp.bfloat16)
    jax.block_until_ready(y)
    assert y.shape == (B, C // 4, H, W), y.shape
    assert y.dtype == jnp.float32

    y_ref = _reference_spp(x, params)

    # Exact f32 path: matches the PyTorch graph up to accumulation order.
    y_f32 = fwd(x, params, compute_dtype=jnp.float32)
    jax.block_until_ready(y_f32)
    np.testing.assert_allclose(np.asarray(y_f32), np.asarray(y_ref), rtol=1e-3, atol=1e-3)

    # bf16 path: bf16-operand-level tolerance.
    np.testing.assert_allclose(np.asarray(y), np.asarray(y_ref), rtol=5e-2, atol=5e-2)

    print("KERNEL_OK")
</pallas_src>

<mosaic_0001>
module attributes {stable_mosaic.version = 11 : i64} {
  func.func @_spp_fused_kernel(%arg0: i32, %arg1: memref<1x16x256xbf16, #tpu.memory_space<vmem>>, %arg2: memref<8x16xbf16, #tpu.memory_space<vmem>>, %arg3: memref<8x1xf32, #tpu.memory_space<vmem>>, %arg4: memref<8x8xbf16, #tpu.memory_space<vmem>>, %arg5: memref<8x1xf32, #tpu.memory_space<vmem>>, %arg6: memref<4x8xbf16, #tpu.memory_space<vmem>>, %arg7: memref<4x1xf32, #tpu.memory_space<vmem>>, %arg8: memref<4x4x2xbf16, #tpu.memory_space<vmem>>, %arg9: memref<256x1xbf16, #tpu.memory_space<vmem>>, %arg10: memref<1x256xbf16, #tpu.memory_space<vmem>>, %arg11: memref<256x4xbf16, #tpu.memory_space<vmem>>, %arg12: memref<4x256xbf16, #tpu.memory_space<vmem>>, %arg13: memref<256x16xbf16, #tpu.memory_space<vmem>>, %arg14: memref<16x256xbf16, #tpu.memory_space<vmem>>, %arg15: memref<256x64xbf16, #tpu.memory_space<vmem>>, %arg16: memref<64x256xbf16, #tpu.memory_space<vmem>>, %arg17: memref<1x4x256xf32, #tpu.memory_space<vmem>>) attributes {dimension_semantics = [#tpu.dimension_semantics<parallel>], iteration_bounds = array<i64: 2>, scalar_prefetch = 0 : i64, scratch_operands = 0 : i64, tpu.core_type = #tpu.core_type<tc>, window_params = [{transform_indices = @transform_0, window_bounds = array<i64: 1, 16, 256>}, {pipeline_mode = #tpu.pipeline_mode<synchronous>, transform_indices = @transform_1, window_bounds = array<i64: 8, 16>}, {pipeline_mode = #tpu.pipeline_mode<synchronous>, transform_indices = @transform_2, window_bounds = array<i64: 8, 1>}, {pipeline_mode = #tpu.pipeline_mode<synchronous>, transform_indices = @transform_3, window_bounds = array<i64: 8, 8>}, {pipeline_mode = #tpu.pipeline_mode<synchronous>, transform_indices = @transform_4, window_bounds = array<i64: 8, 1>}, {pipeline_mode = #tpu.pipeline_mode<synchronous>, transform_indices = @transform_5, window_bounds = array<i64: 4, 8>}, {pipeline_mode = #tpu.pipeline_mode<synchronous>, transform_indices = @transform_6, window_bounds = array<i64: 4, 1>}, {pipeline_mode = #tpu.pipeline_mode<synchronous>, transform_indices = @transform_7, window_bounds = array<i64: 4, 4, 2>}, {pipeline_mode = #tpu.pipeline_mode<synchronous>, transform_indices = @transform_8, window_bounds = array<i64: 256, 1>}, {pipeline_mode = #tpu.pipeline_mode<synchronous>, transform_indices = @transform_9, window_bounds = array<i64: 1, 256>}, {pipeline_mode = #tpu.pipeline_mode<synchronous>, transform_indices = @transform_10, window_bounds = array<i64: 256, 4>}, {pipeline_mode = #tpu.pipeline_mode<synchronous>, transform_indices = @transform_11, window_bounds = array<i64: 4, 256>}, {pipeline_mode = #tpu.pipeline_mode<synchronous>, transform_indices = @transform_12, window_bounds = array<i64: 256, 16>}, {pipeline_mode = #tpu.pipeline_mode<synchronous>, transform_indices = @transform_13, window_bounds = array<i64: 16, 256>}, {pipeline_mode = #tpu.pipeline_mode<synchronous>, transform_indices = @transform_14, window_bounds = array<i64: 256, 64>}, {pipeline_mode = #tpu.pipeline_mode<synchronous>, transform_indices = @transform_15, window_bounds = array<i64: 64, 256>}, {transform_indices = @transform_16, window_bounds = array<i64: 1, 4, 256>}]} {
    %c0 = arith.constant 0 : index
    %c0_0 = arith.constant 0 : index
    %c0_1 = arith.constant 0 : index
    %0 = vector.load %arg1[%c0, %c0_0, %c0_1] : memref<1x16x256xbf16, #tpu.memory_space<vmem>>, vector<1x16x256xbf16>
    %1 = vector.shape_cast %0 : vector<1x16x256xbf16> to vector<16x256xbf16>
    %c0_2 = arith.constant 0 : index
    %c0_3 = arith.constant 0 : index
    %2 = vector.load %arg2[%c0_2, %c0_3] : memref<8x16xbf16, #tpu.memory_space<vmem>>, vector<8x16xbf16>
    %cst = arith.constant dense<0.000000e+00> : vector<8x256xf32>
    %3 = tpu.matmul %2, %1, %cst {dimension_numbers = #tpu.dot_dimension_numbers<[1], [0], [0], [1], [0, 0, 1, 1], [], []>} : vector<8x16xbf16>, vector<16x256xbf16>, vector<8x256xf32> -> vector<8x256xf32>
    %c0_4 = arith.constant 0 : index
    %c0_5 = arith.constant 0 : index
    %4 = vector.load %arg3[%c0_4, %c0_5] : memref<8x1xf32, #tpu.memory_space<vmem>>, vector<8x1xf32>
    %5 = vector.broadcast %4 : vector<8x1xf32> to vector<8x256xf32>
    %6 = arith.addf %3, %5 : vector<8x256xf32>
    %7 = arith.truncf %6 : vector<8x256xf32> to vector<8x256xbf16>
    %c0_6 = arith.constant 0 : index
    %c0_7 = arith.constant 0 : index
    %8 = vector.load %arg4[%c0_6, %c0_7] : memref<8x8xbf16, #tpu.memory_space<vmem>>, vector<8x8xbf16>
    %cst_8 = arith.constant dense<0.000000e+00> : vector<8x256xf32>
    %9 = tpu.matmul %8, %7, %cst_8 {dimension_numbers = #tpu.dot_dimension_numbers<[1], [0], [0], [1], [0, 0, 1, 1], [], []>} : vector<8x8xbf16>, vector<8x256xbf16>, vector<8x256xf32> -> vector<8x256xf32>
    %c0_9 = arith.constant 0 : index
    %c0_10 = arith.constant 0 : index
    %10 = vector.load %arg5[%c0_9, %c0_10] : memref<8x1xf32, #tpu.memory_space<vmem>>, vector<8x1xf32>
    %11 = vector.broadcast %10 : vector<8x1xf32> to vector<8x256xf32>
    %12 = arith.addf %9, %11 : vector<8x256xf32>
    %13 = arith.truncf %12 : vector<8x256xf32> to vector<8x256xbf16>
    %c0_11 = arith.constant 0 : index
    %c0_12 = arith.constant 0 : index
    %14 = vector.load %arg6[%c0_11, %c0_12] : memref<4x8xbf16, #tpu.memory_space<vmem>>, vector<4x8xbf16>
    %cst_13 = arith.constant dense<0.000000e+00> : vector<4x256xf32>
    %15 = tpu.matmul %14, %7, %cst_13 {dimension_numbers = #tpu.dot_dimension_numbers<[1], [0], [0], [1], [0, 0, 1, 1], [], []>} : vector<4x8xbf16>, vector<8x256xbf16>, vector<4x256xf32> -> vector<4x256xf32>
    %c0_14 = arith.constant 0 : index
    %c0_15 = arith.constant 0 : index
    %16 = vector.load %arg7[%c0_14, %c0_15] : memref<4x1xf32, #tpu.memory_space<vmem>>, vector<4x1xf32>
    %17 = vector.broadcast %16 : vector<4x1xf32> to vector<4x256xf32>
    %18 = arith.addf %15, %17 : vector<4x256xf32>
    %19 = vector.extract_strided_slice %13 {offsets = [0, 0], sizes = [2, 256], strides = [1, 1]} : vector<8x256xbf16> to vector<2x256xbf16>
    %c0_16 = arith.constant 0 : index
    %c0_17 = arith.constant 0 : index
    %20 = vector.load %arg9[%c0_16, %c0_17] : memref<256x1xbf16, #tpu.memory_space<vmem>>, vector<256x1xbf16>
    %cst_18 = arith.constant dense<0.000000e+00> : vector<2x1xf32>
    %21 = tpu.matmul %19, %20, %cst_18 {dimension_numbers = #tpu.dot_dimension_numbers<[1], [0], [0], [1], [0, 0, 1, 1], [], []>} : vector<2x256xbf16>, vector<256x1xbf16>, vector<2x1xf32> -> vector<2x1xf32>
    %c0_19 = arith.constant 0 : index
    %c0_20 = arith.constant 0 : index
    %c0_21 = arith.constant 0 : index
    %22 = vector.load %arg8[%c0_19, %c0_20, %c0_21] : memref<4x4x2xbf16, #tpu.memory_space<vmem>>, vector<1x4x2xbf16>
    %23 = vector.shape_cast %22 : vector<1x4x2xbf16> to vector<4x2xbf16>
    %24 = arith.truncf %21 : vector<2x1xf32> to vector<2x1xbf16>
    %cst_22 = arith.constant dense<0.000000e+00> : vector<4x1xf32>
    %25 = tpu.matmul %23, %24, %cst_22 {dimension_numbers = #tpu.dot_dimension_numbers<[1], [0], [0], [1], [0, 0, 1, 1], [], []>} : vector<4x2xbf16>, vector<2x1xbf16>, vector<4x1xf32> -> vector<4x1xf32>
    %c0_23 = arith.constant 0 : index
    %c0_24 = arith.constant 0 : index
    %26 = vector.load %arg10[%c0_23, %c0_24] : memref<1x256xbf16, #tpu.memory_space<vmem>>, vector<1x256xbf16>
    %27 = arith.extf %26 : vector<1x256xbf16> to vector<1x256xf32>
    %28 = vector.broadcast %25 : vector<4x1xf32> to vector<4x256xf32>
    %29 = vector.broadcast %27 : vector<1x256xf32> to vector<4x256xf32>
    %30 = arith.mulf %28, %29 : vector<4x256xf32>
    %31 = arith.addf %18, %30 : vector<4x256xf32>
    %32 = vector.extract_strided_slice %13 {offsets = [2, 0], sizes = [2, 256], strides = [1, 1]} : vector<8x256xbf16> to vector<2x256xbf16>
    %c0_25 = arith.constant 0 : index
    %c0_26 = arith.constant 0 : index
    %33 = vector.load %arg11[%c0_25, %c0_26] : memref<256x4xbf16, #tpu.memory_space<vmem>>, vector<256x4xbf16>
    %cst_27 = arith.constant dense<0.000000e+00> : vector<2x4xf32>
    %34 = tpu.matmul %32, %33, %cst_27 {dimension_numbers = #tpu.dot_dimension_numbers<[1], [0], [0], [1], [0, 0, 1, 1], [], []>} : vector<2x256xbf16>, vector<256x4xbf16>, vector<2x4xf32> -> vector<2x4xf32>
    %c1 = arith.constant 1 : index
    %c0_28 = arith.constant 0 : index
    %c0_29 = arith.constant 0 : index
    %35 = vector.load %arg8[%c1, %c0_28, %c0_29] : memref<4x4x2xbf16, #tpu.memory_space<vmem>>, vector<1x4x2xbf16>
    %36 = vector.shape_cast %35 : vector<1x4x2xbf16> to vector<4x2xbf16>
    %37 = arith.truncf %34 : vector<2x4xf32> to vector<2x4xbf16>
    %cst_30 = arith.constant dense<0.000000e+00> : vector<4x4xf32>
    %38 = tpu.matmul %36, %37, %cst_30 {dimension_numbers = #tpu.dot_dimension_numbers<[1], [0], [0], [1], [0, 0, 1, 1], [], []>} : vector<4x2xbf16>, vector<2x4xbf16>, vector<4x4xf32> -> vector<4x4xf32>
    %39 = arith.truncf %38 : vector<4x4xf32> to vector<4x4xbf16>
    %c0_31 = arith.constant 0 : index
    %c0_32 = arith.constant 0 : index
    %40 = vector.load %arg12[%c0_31, %c0_32] : memref<4x256xbf16, #tpu.memory_space<vmem>>, vector<4x256xbf16>
    %cst_33 = arith.constant dense<0.000000e+00> : vector<4x256xf32>
    %41 = tpu.matmul %39, %40, %cst_33 {dimension_numbers = #tpu.dot_dimension_numbers<[1], [0], [0], [1], [0, 0, 1, 1], [], []>} : vector<4x4xbf16>, vector<4x256xbf16>, vector<4x256xf32> -> vector<4x256xf32>
    %42 = arith.addf %31, %41 : vector<4x256xf32>
    %43 = vector.extract_strided_slice %13 {offsets = [4, 0], sizes = [2, 256], strides = [1, 1]} : vector<8x256xbf16> to vector<2x256xbf16>
    %c0_34 = arith.constant 0 : index
    %c0_35 = arith.constant 0 : index
    %44 = vector.load %arg13[%c0_34, %c0_35] : memref<256x16xbf16, #tpu.memory_space<vmem>>, vector<256x16xbf16>
    %cst_36 = arith.constant dense<0.000000e+00> : vector<2x16xf32>
    %45 = tpu.matmul %43, %44, %cst_36 {dimension_numbers = #tpu.dot_dimension_numbers<[1], [0], [0], [1], [0, 0, 1, 1], [], []>} : vector<2x256xbf16>, vector<256x16xbf16>, vector<2x16xf32> -> vector<2x16xf32>
    %c2 = arith.constant 2 : index
    %c0_37 = arith.constant 0 : index
    %c0_38 = arith.constant 0 : index
    %46 = vector.load %arg8[%c2, %c0_37, %c0_38] : memref<4x4x2xbf16, #tpu.memory_space<vmem>>, vector<1x4x2xbf16>
    %47 = vector.shape_cast %46 : vector<1x4x2xbf16> to vector<4x2xbf16>
    %48 = arith.truncf %45 : vector<2x16xf32> to vector<2x16xbf16>
    %cst_39 = arith.constant dense<0.000000e+00> : vector<4x16xf32>
    %49 = tpu.matmul %47, %48, %cst_39 {dimension_numbers = #tpu.dot_dimension_numbers<[1], [0], [0], [1], [0, 0, 1, 1], [], []>} : vector<4x2xbf16>, vector<2x16xbf16>, vector<4x16xf32> -> vector<4x16xf32>
    %50 = arith.truncf %49 : vector<4x16xf32> to vector<4x16xbf16>
    %c0_40 = arith.constant 0 : index
    %c0_41 = arith.constant 0 : index
    %51 = vector.load %arg14[%c0_40, %c0_41] : memref<16x256xbf16, #tpu.memory_space<vmem>>, vector<16x256xbf16>
    %cst_42 = arith.constant dense<0.000000e+00> : vector<4x256xf32>
    %52 = tpu.matmul %50, %51, %cst_42 {dimension_numbers = #tpu.dot_dimension_numbers<[1], [0], [0], [1], [0, 0, 1, 1], [], []>} : vector<4x16xbf16>, vector<16x256xbf16>, vector<4x256xf32> -> vector<4x256xf32>
    %53 = arith.addf %42, %52 : vector<4x256xf32>
    %54 = vector.extract_strided_slice %13 {offsets = [6, 0], sizes = [2, 256], strides = [1, 1]} : vector<8x256xbf16> to vector<2x256xbf16>
    %c0_43 = arith.constant 0 : index
    %c0_44 = arith.constant 0 : index
    %55 = vector.load %arg15[%c0_43, %c0_44] : memref<256x64xbf16, #tpu.memory_space<vmem>>, vector<256x64xbf16>
    %cst_45 = arith.constant dense<0.000000e+00> : vector<2x64xf32>
    %56 = tpu.matmul %54, %55, %cst_45 {dimension_numbers = #tpu.dot_dimension_numbers<[1], [0], [0], [1], [0, 0, 1, 1], [], []>} : vector<2x256xbf16>, vector<256x64xbf16>, vector<2x64xf32> -> vector<2x64xf32>
    %c3 = arith.constant 3 : index
    %c0_46 = arith.constant 0 : index
    %c0_47 = arith.constant 0 : index
    %57 = vector.load %arg8[%c3, %c0_46, %c0_47] : memref<4x4x2xbf16, #tpu.memory_space<vmem>>, vector<1x4x2xbf16>
    %58 = vector.shape_cast %57 : vector<1x4x2xbf16> to vector<4x2xbf16>
    %59 = arith.truncf %56 : vector<2x64xf32> to vector<2x64xbf16>
    %cst_48 = arith.constant dense<0.000000e+00> : vector<4x64xf32>
    %60 = tpu.matmul %58, %59, %cst_48 {dimension_numbers = #tpu.dot_dimension_numbers<[1], [0], [0], [1], [0, 0, 1, 1], [], []>} : vector<4x2xbf16>, vector<2x64xbf16>, vector<4x64xf32> -> vector<4x64xf32>
    %61 = arith.truncf %60 : vector<4x64xf32> to vector<4x64xbf16>
    %c0_49 = arith.constant 0 : index
    %c0_50 = arith.constant 0 : index
    %62 = vector.load %arg16[%c0_49, %c0_50] : memref<64x256xbf16, #tpu.memory_space<vmem>>, vector<64x256xbf16>
    %cst_51 = arith.constant dense<0.000000e+00> : vector<4x256xf32>
    %63 = tpu.matmul %61, %62, %cst_51 {dimension_numbers = #tpu.dot_dimension_numbers<[1], [0], [0], [1], [0, 0, 1, 1], [], []>} : vector<4x64xbf16>, vector<64x256xbf16>, vector<4x256xf32> -> vector<4x256xf32>
    %64 = arith.addf %53, %63 : vector<4x256xf32>
    %c0_52 = arith.constant 0 : index
    %c0_53 = arith.constant 0 : index
    %c0_54 = arith.constant 0 : index
    %65 = vector.load %arg17[%c0_52, %c0_53, %c0_54] : memref<1x4x256xf32, #tpu.memory_space<vmem>>, vector<1x4x256xf32>
    %66 = vector.shape_cast %65 : vector<1x4x256xf32> to vector<4x256xf32>
    %67 = vector.shape_cast %64 : vector<4x256xf32> to vector<1x4x256xf32>
    tpu.vector_store %arg17[%c0_52, %c0_53, %c0_54], %67 {strides = array<i32>} : memref<1x4x256xf32, #tpu.memory_space<vmem>>, vector<1x4x256xf32>,
    return
  }
  func.func @transform_0(%arg0: i32) -> (i32, i32, i32) {
    %c0_i32 = arith.constant 0 : i32
    %c0_i32_0 = arith.constant 0 : i32
    %c0_i32_1 = arith.constant 0 : i32
    return %arg0, %c0_i32, %c0_i32_0 : i32, i32, i32
  }
  func.func @transform_1(%arg0: i32) -> (i32, i32) {
    %c0_i32 = arith.constant 0 : i32
    %c0_i32_0 = arith.constant 0 : i32
    %c0_i32_1 = arith.constant 0 : i32
    return %c0_i32, %c0_i32_0 : i32, i32
  }
  func.func @transform_2(%arg0: i32) -> (i32, i32) {
    %c0_i32 = arith.constant 0 : i32
    %c0_i32_0 = arith.constant 0 : i32
    %c0_i32_1 = arith.constant 0 : i32
    return %c0_i32, %c0_i32_0 : i32, i32
  }
  func.func @transform_3(%arg0: i32) -> (i32, i32) {
    %c0_i32 = arith.constant 0 : i32
    %c0_i32_0 = arith.constant 0 : i32
    %c0_i32_1 = arith.constant 0 : i32
    return %c0_i32, %c0_i32_0 : i32, i32
  }
  func.func @transform_4(%arg0: i32) -> (i32, i32) {
    %c0_i32 = arith.constant 0 : i32
    %c0_i32_0 = arith.constant 0 : i32
    %c0_i32_1 = arith.constant 0 : i32
    return %c0_i32, %c0_i32_0 : i32, i32
  }
  func.func @transform_5(%arg0: i32) -> (i32, i32) {
    %c0_i32 = arith.constant 0 : i32
    %c0_i32_0 = arith.constant 0 : i32
    %c0_i32_1 = arith.constant 0 : i32
    return %c0_i32, %c0_i32_0 : i32, i32
  }
  func.func @transform_6(%arg0: i32) -> (i32, i32) {
    %c0_i32 = arith.constant 0 : i32
    %c0_i32_0 = arith.constant 0 : i32
    %c0_i32_1 = arith.constant 0 : i32
    return %c0_i32, %c0_i32_0 : i32, i32
  }
  func.func @transform_7(%arg0: i32) -> (i32, i32, i32) {
    %c0_i32 = arith.constant 0 : i32
    %c0_i32_0 = arith.constant 0 : i32
    %c0_i32_1 = arith.constant 0 : i32
    %c0_i32_2 = arith.constant 0 : i32
    return %c0_i32, %c0_i32_0, %c0_i32_1 : i32, i32, i32
  }
  func.func @transform_8(%arg0: i32) -> (i32, i32) {
    %c0_i32 = arith.constant 0 : i32
    %c0_i32_0 = arith.constant 0 : i32
    %c0_i32_1 = arith.constant 0 : i32
    return %c0_i32, %c0_i32_0 : i32, i32
  }
  func.func @transform_9(%arg0: i32) -> (i32, i32) {
    %c0_i32 = arith.constant 0 : i32
    %c0_i32_0 = arith.constant 0 : i32
    %c0_i32_1 = arith.constant 0 : i32
    return %c0_i32, %c0_i32_0 : i32, i32
  }
  func.func @transform_10(%arg0: i32) -> (i32, i32) {
    %c0_i32 = arith.constant 0 : i32
    %c0_i32_0 = arith.constant 0 : i32
    %c0_i32_1 = arith.constant 0 : i32
    return %c0_i32, %c0_i32_0 : i32, i32
  }
  func.func @transform_11(%arg0: i32) -> (i32, i32) {
    %c0_i32 = arith.constant 0 : i32
    %c0_i32_0 = arith.constant 0 : i32
    %c0_i32_1 = arith.constant 0 : i32
    return %c0_i32, %c0_i32_0 : i32, i32
  }
  func.func @transform_12(%arg0: i32) -> (i32, i32) {
    %c0_i32 = arith.constant 0 : i32
    %c0_i32_0 = arith.constant 0 : i32
    %c0_i32_1 = arith.constant 0 : i32
    return %c0_i32, %c0_i32_0 : i32, i32
  }
  func.func @transform_13(%arg0: i32) -> (i32, i32) {
    %c0_i32 = arith.constant 0 : i32
    %c0_i32_0 = arith.constant 0 : i32
    %c0_i32_1 = arith.constant 0 : i32
    return %c0_i32, %c0_i32_0 : i32, i32
  }
  func.func @transform_14(%arg0: i32) -> (i32, i32) {
    %c0_i32 = arith.constant 0 : i32
    %c0_i32_0 = arith.constant 0 : i32
    %c0_i32_1 = arith.constant 0 : i32
    return %c0_i32, %c0_i32_0 : i32, i32
  }
  func.func @transform_15(%arg0: i32) -> (i32, i32) {
    %c0_i32 = arith.constant 0 : i32
    %c0_i32_0 = arith.constant 0 : i32
    %c0_i32_1 = arith.constant 0 : i32
    return %c0_i32, %c0_i32_0 : i32, i32
  }
  func.func @transform_16(%arg0: i32) -> (i32, i32, i32) {
    %c0_i32 = arith.constant 0 : i32
    %c0_i32_0 = arith.constant 0 : i32
    %c0_i32_1 = arith.constant 0 : i32
    return %arg0, %c0_i32, %c0_i32_0 : i32, i32, i32
  }
}

</mosaic_0001>

<bundles_post_ra>
// kernel: spatial_pyramid_pooling.1
= control target key start
LH: loop header
LB: loop body
LE: loop exit
PB: predicated region body
PF: predicated region fallthrough
CT: control target
= control target key end

     0   :  { %s2325_s21 = smov 0   ;;  %s2648_s0 = inlined_call_operand.vmem [shape: bf16[2,16,256], index: 0, kind: input, shape index: {}]   ;;  %s2649_s1 = inlined_call_operand.vmem [shape: bf16[8,16], index: 1, kind: input, shape index: {}]   ;;  %s2650_s2 = inlined_call_operand.vmem [shape: f32[8,1], index: 2, kind: input, shape index: {}]   ;;  %s2651_s3 = inlined_call_operand.vmem [shape: bf16[8,8], index: 3, kind: input, shape index: {}]   ;;  %s2652_s4 = inlined_call_operand.vmem [shape: f32[8,1], index: 4, kind: input, shape index: {}]   ;;  %s2653_s5 = inlined_call_operand.vmem [shape: bf16[4,8], index: 5, kind: input, shape index: {}]   ;;  %s2654_s6 = inlined_call_operand.vmem [shape: f32[4,1], index: 6, kind: input, shape index: {}]   ;;  %s2655_s7 = inlined_call_operand.vmem [shape: bf16[4,4,2], index: 7, kind: input, shape index: {}]   ;;  %s2656_s8 = inlined_call_operand.vmem [shape: bf16[256,1], index: 8, kind: input, shape index: {}]   ;;  %s2657_s9 = inlined_call_operand.vmem [shape: bf16[1,256], index: 9, kind: input, shape index: {}]   ;;  %s2658_s10 = inlined_call_operand.vmem [shape: bf16[256,4], index: 10, kind: input, shape index: {}]   ;;  %s2659_s11 = inlined_call_operand.vmem [shape: bf16[4,256], index: 11, kind: input, shape index: {}]   ;;  %s2660_s12 = inlined_call_operand.vmem [shape: bf16[256,16], index: 12, kind: input, shape index: {}]   ;;  %s2661_s13 = inlined_call_operand.vmem [shape: bf16[16,256], index: 13, kind: input, shape index: {}]   ;;  %s2662_s14 = inlined_call_operand.vmem [shape: bf16[256,64], index: 14, kind: input, shape index: {}]   ;;  %s2663_s15 = inlined_call_operand.vmem [shape: bf16[64,256], index: 15, kind: input, shape index: {}]   ;;  %s2664_s16 = inlined_call_operand.vmem [shape: f32[2,4,256], index: 16, kind: output, shape index: {}]  }
   0x1   :  { %2665 = sst [smem:[#allocation2_spill]] %s2648_s0 }
   0x2 LB: > { %s1894_s22 = sadd.s32 4294967295, %s2235_s21   ;;  %p1898_p0 = scmp.ge.s32.totalorder %s2235_s21, 1  ;;  %s2235_s21 = sphi %s2325_s21, %s26_s21  }
   0x3   : > { %p462_p1 = scmp.lt.s32.totalorder %s2235_s21, 3 }
   0x5   : > { %p463_p2 = pnand %p1898_p0, %p462_p1 }
   0x6   : > { %p512_p3 = scmp.lt.s32.totalorder (!%p463_p2), %s1894_s22, 1  ;;  %v526_v0 = vld [vmem:[%s2650_s2] sm:$0xff] (!%p463_p2)  ;;  %v2237_v1 = vmov (!%p463_p2), 0   ;;  %s2666_s30 = sld [smem:[#allocation2_spill]] (!%p463_p2)  ;;  %vm542_vm0 = vcmask (!%p463_p2), 130048   ;;  %vm600_vm1 = vcmask (!%p463_p2), 1043456  }
   0x7   : > { %466 = sbr.rel (%p463_p2) target bundleno = 2087 (0x827), region = 84  ;;  %578 = vmatprep.mubr.bf16.mxu0 (!%p463_p2), %v2237_v1  ;;  %2145 = vset.pattern.permute.xlu0 (!%p463_p2), %v2237_v1  ;;  %v590_v2 = vld [vmem:[%s2652_s4] sm:$0xff] (!%p463_p2)  ;;  %vm596_vm2 = vcmask (!%p463_p2), 64512   ;;  %v2152_v19 = vld [vmem:[%s2656_s8 + $0x48] sm:$0xff] (!%p463_p2)   ;;  %v2154_v21 = vld [vmem:[%s2656_s8 + $0x50] sm:$0xff] (!%p463_p2)   ;;  %v2238_v43 = vmov (!%p463_p2), 0.0  }
   0x8   : > { %529 = vperm.xlu0 (!%p463_p2), %2145, %v526_v0   ;;  %639 = vmatprep.mubr.bf16.mxu1 (!%p463_p2), %v2237_v1  ;;  %v525_v5 = vld [vmem:[%s2649_s1] sm:$0xf] (!%p463_p2)  ;;  %v2153_v20 = vld [vmem:[%s2656_s8 + $0x8] sm:$0xff] (!%p463_p2)   ;;  %v2155_v22 = vld [vmem:[%s2656_s8 + $0x10] sm:$0xff] (!%p463_p2)   ;;  %vm2239_vm3 = vmmov (!%p463_p2), 0   ;;  %vm875_vm4 = vcmask (!%p463_p2), 1040384  }
   0x9   : > { %2146 = vset.pattern.permute.xlu1 (!%p463_p2), %v2237_v1  ;;  %v2150_v15 = vld [vmem:[%s2656_s8 + $0x40] sm:$0xff] (!%p463_p2)   ;;  %v2156_v23 = vld [vmem:[%s2656_s8 + $0x58] sm:$0xff] (!%p463_p2)   ;;  %v2160_v27 = vld [vmem:[%s2656_s8 + $0x68] sm:$0xff] (!%p463_p2)   ;;  %vm871_vm5 = vcmask (!%p463_p2), 15360   ;;  %vm1187_vm6 = vcmask (!%p463_p2), 1041408   ;;  %vm1183_vm7 = vcmask (!%p463_p2), 31744  }
   0xa   : > { %v589_v17 = vld [vmem:[%s2651_s3] sm:$0xf] (!%p463_p2)  ;;  %v2157_v24 = vld [vmem:[%s2656_s8 + $0x18] sm:$0xff] (!%p463_p2)   ;;  %v2161_v28 = vld [vmem:[%s2656_s8 + $0x28] sm:$0xff] (!%p463_p2)   ;;  %vm1787_vm8 = vcmask (!%p463_p2), 523264  }
   0xb   : > { %v2151_v18 = vld [vmem:[%s2656_s8] sm:$0xff] (!%p463_p2)   ;;  %v2162_v29 = vld [vmem:[%s2656_s8 + $0x70] sm:$0xff] (!%p463_p2)   ;;  %v2164_v31 = vld [vmem:[%s2656_s8 + $0x78] sm:$0xff] (!%p463_p2)  }
   0xc   : > { %593 = vperm.xlu0 (!%p463_p2), %2145, %v590_v2   ;;  %v2158_v25 = vld [vmem:[%s2656_s8 + $0x60] sm:$0xff] (!%p463_p2)   ;;  %v2163_v30 = vld [vmem:[%s2656_s8 + $0x30] sm:$0xff] (!%p463_p2)   ;;  %v2165_v32 = vld [vmem:[%s2656_s8 + $0x38] sm:$0xff] (!%p463_p2)  }
   0xd   : > { %v2159_v26 = vld [vmem:[%s2656_s8 + $0x20] sm:$0xff] (!%p463_p2)   ;;  %v2168_v54 = vld [vmem:[%s2658_s10 + $0x48] sm:$0xff] (!%p463_p2)   ;;  %v2170_v57 = vld [vmem:[%s2658_s10 + $0x50] sm:$0xff] (!%p463_p2)  }
   0xe   : > { %s2668_s22 = smov (!%p512_p3, %s1894_s22), 1  ;;  %v650_v42 = vld [vmem:[%s2653_s5] sm:$0x3]  ;;  %v2169_v56 = vld [vmem:[%s2658_s10 + $0x8] sm:$0xff]   ;;  %v2171_v58 = vld [vmem:[%s2658_s10 + $0x10] sm:$0xff]  }
   0xf   : > { %s1998_s27 = sshll.u32 %s2668_s22, 4  ;;  %v2166_v50 = vld [vmem:[%s2658_s10 + $0x40] sm:$0xff]   ;;  %v2172_v59 = vld [vmem:[%s2658_s10 + $0x58] sm:$0xff]   ;;  %v2176_v63 = vld [vmem:[%s2658_s10 + $0x68] sm:$0xff]  }
  0x10   : > { %s516_s0 = scalar_lea.vmem %s2666_s30, %s1998_s27  ;;  %v869_v52 = vld [vmem:[%s2655_s7] sm:$0x3]  ;;  %v2173_v60 = vld [vmem:[%s2658_s10 + $0x18] sm:$0xff]   ;;  %v2177_v0 = vld [vmem:[%s2658_s10 + $0x28] sm:$0xff]  }
  0x11   : > { %v2147_v3 = vld [vmem:[%s516_s0 + $0x4] ss:$8 sps:$4 sm:$0xff]   ;;  %v2149_v4 = vld [vmem:[%s516_s0] ss:$8 sps:$4 sm:$0xff]   ;;  %v2178_v2 = vld [vmem:[%s2658_s10 + $0x70] sm:$0xff]   ;;  %s1999_s0 = sshll.u32 %s2668_s22, 3 }
  0x12   : > { %546 = vmatprep.subr.bf16.mxu0 %v2147_v3  ;;  %v2167_v53 = vld [vmem:[%s2658_s10] sm:$0xff]   ;;  %v2179_v3 = vld [vmem:[%s2658_s10 + $0x30] sm:$0xff]   ;;  %s521_s19 = scalar_lea.vmem %s2664_s16, %s1999_s0 }
  0x13   : > { %547 = vmatpush1.bf16.msra.mxu0 %v2149_v4  ;;  %v2174_v61 = vld [vmem:[%s2658_s10 + $0x60] sm:$0xff]   ;;  %v2180_v4 = vld [vmem:[%s2658_s10 + $0x78] sm:$0xff]  }
  0x14   : > { %v2175_v62 = vld [vmem:[%s2658_s10 + $0x20] sm:$0xff]  }
  0x16   : > { %1905 = vmatmul.mubr.msk.bf16.vlgmr.msra.gmra.mrb[0].mxu0 %vm542_vm0, %v525_v5  ;;  %v2181_v5 = vld [vmem:[%s2658_s10 + $0x38] sm:$0xff]  }
  0x17   : > { %692 = vmatprep.mubr.bf16.mxu0 %v2237_v1 }
  0x87   : > { %v530_v6 = vpop.permute.xlu0 %529 }
  0x8b   : > { %v594_v33 = vpop.permute.xlu0 %593 }
  0xe9   : > { %v580_v7 = vpop.f32.mrb[0].mxu0 }
  0xea   : > { %v581_v8 = vadd.f32 %v580_v7, %v530_v6  ;;  %v582_v9 = vpop.f32.mrb[1].mxu0 }
  0xeb   : > { %v583_v10 = vadd.f32 %v582_v9, %v530_v6  ;;  %v584_v11 = vpop.f32.mrb[2].mxu0 }
  0xec   : > { %v587_v12 = vpack.c.bf16 %v581_v8, %v581_v8  ;;  %v585_v13 = vpop.f32.mrb[3].mxu0 }
  0xed   : > { %v588_v14 = vpack.c.bf16 %v583_v10, %v583_v10  ;;  %v651_v10 = vld [vmem:[%s2654_s6] sm:$0xf] }
  0xee   : > { %v602_v16 = vsel %vm600_vm1, %v587_v12, 0 }
  0xef   : > { %1906 = vmatprep.subr.msk.bf16.mxu1 %vm600_vm1, %v588_v14  ;;  %1908 = vmatprep.subr.msk.bf16.mxu0 %vm600_vm1, %v588_v14 }
  0xf0   : > { %608 = vmatpush1.bf16.msra.mxu1 %v602_v16  ;;  %661 = vmatpush1.bf16.msra.mxu0 %v602_v16 }
  0xf1   : > { %2000 = vmatprep.subr.bf16.mxu1 %v2150_v15  ;;  %2096 = vmatprep.subr.bf16.mxu0 %v2238_v43 }
  0xf3   : > { %1907 = vmatmul.mubr.msk.bf16.vlgmr.msra.gmra.mrb[0].mxu1 %vm596_vm2, %v589_v17  ;;  %1909 = vmatmul.mubr.msk.bf16.vlgmr.msra.gmra.mrb[4].mxu0 %vm596_vm2, %v650_v42 }
  0xf4   : > { %2001 = vmatpush3.bf16.msra.mxu1 %v2151_v18  ;;  %2098 = vmatprep.mubr.msk.bf16.mxu0 %vm2239_vm3, %v2238_v43  ;;  %v2182_v18 = vld [vmem:[%s2660_s12 + $0x40] sm:$0xff]  }
  0xf5   : > { %2002 = vmatprep.subr.bf16.mxu1 %v2152_v19 }
  0xf8   : > { %2003 = vmatpush3.bf16.msra.mxu1 %v2153_v20  ;;  %v1943_v20 = vld [vmem:[%s2655_s7 + $0x2] sm:$0x3] }
  0xf9   : > { %2004 = vmatprep.subr.bf16.mxu1 %v2154_v21  ;;  %v2183_v21 = vld [vmem:[%s2660_s12] sm:$0xff]  }
  0xfc   : > { %2005 = vmatpush3.bf16.msra.mxu1 %v2155_v22  ;;  %v2184_v22 = vld [vmem:[%s2660_s12 + $0x48] sm:$0xff]  }
  0xfd   : > { %2006 = vmatprep.subr.bf16.mxu1 %v2156_v23 }
 0x100   : > { %2007 = vmatpush3.bf16.msra.mxu1 %v2157_v24  ;;  %v2185_v24 = vld [vmem:[%s2660_s12 + $0x8] sm:$0xff]  }
 0x101   : > { %2008 = vmatprep.subr.bf16.mxu1 %v2158_v25  ;;  %v2186_v25 = vld [vmem:[%s2660_s12 + $0x50] sm:$0xff]  }
 0x104   : > { %2009 = vmatpush3.bf16.msra.mxu1 %v2159_v26  ;;  %v2187_v26 = vld [vmem:[%s2660_s12 + $0x10] sm:$0xff]  }
 0x105   : > { %2010 = vmatprep.subr.bf16.mxu1 %v2160_v27  ;;  %v2188_v27 = vld [vmem:[%s2660_s12 + $0x58] sm:$0xff]  }
 0x108   : > { %2011 = vmatpush3.bf16.msra.mxu1 %v2161_v28  ;;  %v2189_v28 = vld [vmem:[%s2660_s12 + $0x18] sm:$0xff]  }
 0x109   : > { %2012 = vmatprep.subr.bf16.mxu1 %v2162_v29  ;;  %v2190_v29 = vld [vmem:[%s2660_s12 + $0x60] sm:$0xff]  }
 0x10c   : > { %2013 = vmatpush3.bf16.msra.mxu1 %v2163_v30  ;;  %v2191_v30 = vld [vmem:[%s2660_s12 + $0x20] sm:$0xff]  }
 0x10d   : > { %2014 = vmatprep.subr.bf16.mxu1 %v2164_v31  ;;  %v2192_v31 = vld [vmem:[%s2660_s12 + $0x68] sm:$0xff]  }
 0x110   : > { %2015 = vmatpush3.bf16.msra.mxu1 %v2165_v32  ;;  %v2193_v32 = vld [vmem:[%s2660_s12 + $0x28] sm:$0xff]  }
 0x111   : > { %2102 = vmatprep.subr.bf16.mxu1 %v2238_v43 }
 0x1c6   : > { %v641_v34 = vpop.f32.mrb[0].mxu1 }
 0x1c7   : > { %v642_v35 = vadd.f32 %v641_v34, %v594_v33  ;;  %v643_v36 = vpop.f32.mrb[1].mxu1  ;;  %v2195_v34 = vld [vmem:[%s2660_s12 + $0x30] sm:$0xff]  }
 0x1c8   : > { %v644_v37 = vadd.f32 %v643_v36, %v594_v33  ;;  %v645_v38 = vpop.f32.mrb[2].mxu1  ;;  %v2194_v33 = vld [vmem:[%s2660_s12 + $0x70] sm:$0xff]   ;;  %v2197_v36 = vld [vmem:[%s2660_s12 + $0x38] sm:$0xff]  }
 0x1c9   : > { %v646_v39 = vpop.f32.mrb[3].mxu1  ;;  %v2408_v41 = vpack.c.bf16 %v642_v35, %v642_v35  ;;  %v2196_v35 = vld [vmem:[%s2660_s12 + $0x78] sm:$0xff]   ;;  %v1945_v38 = vld.sshfl [vmem:[%s2659_s11] sm:$0x33 pattern:$0x76325410] }
 0x1ca   : > { %v2406_v40 = vpack.c.bf16 %v644_v37, %v644_v37  ;;  %v1182_v39 = vcombine.high %v1945_v38, %v1945_v38  ;;  %v1189_v42 = vsel %vm1187_vm6, %v1945_v38, 0 }
 0x1cb   : > { %v983_v6 = vrot.slane %v2408_v41, 1  ;;  %v1269_v37 = vrot.slane %v2408_v41, 2 }
 0x1cc   : > { %861 = vmatprep.mubr.bf16.mxu1 %v2406_v40  ;;  %v984_v55 = vrot.slane %v2406_v40, 1  ;;  %v1270_v23 = vrot.slane %v2406_v40, 2 }
 0x1cd   : > { %862 = vmatmul.mubr.bf16.vlgmr.msra.gmra.mrb[4].mxu1 %v2408_v41 }
 0x1ce   : > { %2104 = vmatprep.mubr.msk.bf16.mxu1 %vm2239_vm3, %v2238_v43 }
 0x2a0   : > { %v2016_v44 = vpop.f32.mrb[4].mxu1 }
 0x2a1   : > { %v2017_v45 = vpop.f32.mrb[5].mxu1 }
 0x2a2   : > { %v2018_v46 = vadd.f32 %v2017_v45, %v2016_v44  ;;  %v2019_v47 = vpop.f32.mrb[6].mxu1 }
 0x2a3   : > { %v2020_v48 = vpop.f32.mrb[7].mxu1 }
 0x2a4   : > { %v870_v49 = vpack.c.bf16 %v2018_v46, %v2018_v46 }
 0x2a6   : > { %v877_v51 = vsel %vm875_vm4, %v870_v49, 0 }
 0x2a7   : > { %2097 = vmatpush3.bf16.msra.mxu0 %v877_v51 }
 0x2a8   : > { %2024 = vmatprep.subr.bf16.mxu0 %v2166_v50 }
 0x2aa   : > { %2099 = vmatmul.mubr.msk.bf16.vlgmr.msra.gmra.mrb[8].mxu0 %vm871_vm5, %v869_v52 }
 0x2ab   : > { %2025 = vmatpush3.bf16.msra.mxu0 %v2167_v53  ;;  %1115 = vmatprep.mubr.bf16.mxu0 %v984_v55  ;;  %v2200_v55 = vld [vmem:[%s2661_s13 + $0x4] ss:$8 sps:$4 sm:$0xff]  }
 0x2ac   : > { %2026 = vmatprep.subr.bf16.mxu0 %v2168_v54 }
 0x2af   : > { %2027 = vmatpush3.bf16.msra.mxu0 %v2169_v56 }
 0x2b0   : > { %2028 = vmatprep.subr.bf16.mxu0 %v2170_v57  ;;  %v1964_v57 = vld [vmem:[%s2655_s7 + $0x4] sm:$0x3] }
 0x2b3   : > { %2029 = vmatpush3.bf16.msra.mxu0 %v2171_v58  ;;  %v2201_v58 = vld [vmem:[%s2662_s14 + $0x40] sm:$0xff]  }
 0x2b4   : > { %2030 = vmatprep.subr.bf16.mxu0 %v2172_v59 }
 0x2b7   : > { %2031 = vmatpush3.bf16.msra.mxu0 %v2173_v60  ;;  %v2202_v60 = vld [vmem:[%s2662_s14] sm:$0xff]  }
 0x2b8   : > { %2032 = vmatprep.subr.bf16.mxu0 %v2174_v61 }
 0x2bb   : > { %2033 = vmatpush3.bf16.msra.mxu0 %v2175_v62 }
 0x2bc   : > { %2034 = vmatprep.subr.bf16.mxu0 %v2176_v63  ;;  %v2203_v63 = vld [vmem:[%s2662_s14 + $0x48] sm:$0xff]  }
 0x2bf   : > { %2035 = vmatpush3.bf16.msra.mxu0 %v2177_v0 }
 0x2c0   : > { %2036 = vmatprep.subr.bf16.mxu0 %v2178_v2  ;;  %v1550_v2 = vrot.slane %v2406_v40, 3  ;;  %v2207_v40 = vld [vmem:[%s2662_s14 + $0x58] sm:$0xff]  }
 0x2c3   : > { %2037 = vmatpush3.bf16.msra.mxu0 %v2179_v3 }
 0x2c4   : > { %2038 = vmatprep.subr.bf16.mxu0 %v2180_v4  ;;  %v2204_v4 = vld [vmem:[%s2662_s14 + $0x8] sm:$0xff]  }
 0x2c7   : > { %2039 = vmatpush3.bf16.msra.mxu0 %v2181_v5  ;;  %v2205_v5 = vld [vmem:[%s2662_s14 + $0x50] sm:$0xff]  }
 0x2c8   : > { %1946 = vmatprep.subr.msk.bf16.mxu0 %vm1187_vm6, %v1182_v39 }
 0x2ca   : > { %1116 = vmatmul.mubr.bf16.vlgmr.msra.gmra.mrb[12].mxu0 %v983_v6  ;;  %v2206_v6 = vld [vmem:[%s2662_s14 + $0x10] sm:$0xff]  }
 0x2cb   : > { %1226 = vmatprep.mubr.bf16.mxu0 %v2237_v1  ;;  %1195 = vmatpush1.bf16.msra.mxu0 %v1189_v42  ;;  %v927_v42 = vlaneseq }
 0x2cc   : > { %2108 = vmatprep.subr.bf16.mxu0 %v2238_v43 }
 0x37d   : > { %v913_v7 = vpop.f32.mrb[8].mxu0 }
 0x37e   : > { %923 = vperm.xlu1 %2146, %v913_v7   ;;  %v2100_v8 = vpop.f32.mrb[9].mxu0  ;;  %v2208_v7 = vld [vmem:[%s2662_s14 + $0x18] sm:$0xff]  }
 0x37f   : > { %v916_v9 = vpop.f32.mrb[10].mxu0  ;;  %v2209_v8 = vld [vmem:[%s2662_s14 + $0x60] sm:$0xff]  }
 0x380   : > { %v2101_v11 = vpop.f32.mrb[11].mxu0  ;;  %v2210_v9 = vld [vmem:[%s2662_s14 + $0x20] sm:$0xff]  }
 0x381   : > { %v2212_v11 = vld [vmem:[%s2662_s14 + $0x28] sm:$0xff]  }
 0x382   : > { %654 = vperm.xlu1 %2146, %v651_v10   ;;  %v2211_v10 = vld [vmem:[%s2662_s14 + $0x68] sm:$0xff]  }
 0x39d   : > { %v2040_v12 = vpop.f32.mrb[12].mxu0 }
 0x39e   : > { %v2041_v13 = vpop.f32.mrb[13].mxu0 }
 0x39f   : > { %v2042_v14 = vadd.f32 %v2041_v13, %v2040_v12  ;;  %v2043_v15 = vpop.f32.mrb[14].mxu0  ;;  %v2213_v12 = vld [vmem:[%s2662_s14 + $0x70] sm:$0xff]  }
 0x3a0   : > { %v2044_v16 = vpop.f32.mrb[15].mxu0  ;;  %v2214_v13 = vld [vmem:[%s2662_s14 + $0x30] sm:$0xff]   ;;  %v2216_v15 = vld [vmem:[%s2662_s14 + $0x38] sm:$0xff]  }
 0x3a1   : > { %v1125_v17 = vpack.c.bf16 %v2042_v14, %v2042_v14  ;;  %v2215_v14 = vld [vmem:[%s2662_s14 + $0x78] sm:$0xff]   ;;  %v1549_v16 = vrot.slane %v2408_v41, 3  ;;  %v1985_v41 = vld [vmem:[%s2655_s7 + $0x6] sm:$0x3] }
 0x3a3   : > { %v1130_v19 = vsel %vm875_vm4, %v1125_v17, 0 }
 0x3a4   : > { %2103 = vmatpush3.bf16.msra.mxu1 %v1130_v19 }
 0x3a5   : > { %2048 = vmatprep.subr.bf16.mxu1 %v2182_v18 }
 0x3a7   : > { %2105 = vmatmul.mubr.msk.bf16.vlgmr.msra.gmra.mrb[8].mxu1 %vm871_vm5, %v1943_v20 }
 0x3a8   : > { %2049 = vmatpush3.bf16.msra.mxu1 %v2183_v21  ;;  %1401 = vmatprep.mubr.bf16.mxu1 %v1270_v23 }
 0x3a9   : > { %2050 = vmatprep.subr.bf16.mxu1 %v2184_v22 }
 0x3ac   : > { %2051 = vmatpush3.bf16.msra.mxu1 %v2185_v24 }
 0x3ad   : > { %2052 = vmatprep.subr.bf16.mxu1 %v2186_v25 }
 0x3b0   : > { %2053 = vmatpush3.bf16.msra.mxu1 %v2187_v26 }
 0x3b1   : > { %2054 = vmatprep.subr.bf16.mxu1 %v2188_v27  ;;  %v2219_v27 = vld [vmem:[%s2663_s15 + $0x4] ss:$8 sps:$4 sm:$0xff]  }
 0x3b4   : > { %2055 = vmatpush3.bf16.msra.mxu1 %v2189_v28 }
 0x3b5   : > { %2056 = vmatprep.subr.bf16.mxu1 %v2190_v29  ;;  %v2217_v29 = vld [vmem:[%s2663_s15] ss:$8 sps:$4 sm:$0xff]  }
 0x3b8   : > { %2057 = vmatpush3.bf16.msra.mxu1 %v2191_v30  ;;  %v2222_v30 = vld [vmem:[%s2663_s15 + $0x14] ss:$8 sps:$4 sm:$0xff]  }
 0x3b9   : > { %2058 = vmatprep.subr.bf16.mxu1 %v2192_v31  ;;  %v2220_v31 = vld [vmem:[%s2663_s15 + $0x10] ss:$8 sps:$4 sm:$0xff]  }
 0x3bc   : > { %2059 = vmatpush3.bf16.msra.mxu1 %v2193_v32  ;;  %v2225_v32 = vld [vmem:[%s2663_s15 + $0x24] ss:$8 sps:$4 sm:$0xff]  }
 0x3bd   : > { %2060 = vmatprep.subr.bf16.mxu1 %v2194_v33  ;;  %v2223_v33 = vld [vmem:[%s2663_s15 + $0x20] ss:$8 sps:$4 sm:$0xff]  }
 0x3c0   : > { %2061 = vmatpush3.bf16.msra.mxu1 %v2195_v34  ;;  %v2228_v34 = vld [vmem:[%s2663_s15 + $0x34] ss:$8 sps:$4 sm:$0xff]  }
 0x3c1   : > { %2062 = vmatprep.subr.bf16.mxu1 %v2196_v35 }
 0x3c4   : > { %2063 = vmatpush3.bf16.msra.mxu1 %v2197_v36 }
 0x3c5   : > { %2114 = vmatprep.subr.bf16.mxu1 %v2238_v43 }
 0x3c7   : > { %1402 = vmatmul.mubr.bf16.vlgmr.msra.gmra.mrb[12].mxu1 %v1269_v37 }
 0x3c8   : > { %2116 = vmatprep.mubr.msk.bf16.mxu1 %vm2239_vm3, %v2238_v43 }
 0x47a   : > { %v1166_v44 = vpop.f32.mrb[8].mxu1 }
 0x47b   : > { %v1172_v45 = vpack.c.bf16 %v1166_v44, %v1166_v44  ;;  %v2106_v46 = vpop.f32.mrb[9].mxu1  ;;  %v928_v44 = vshrl.u32 %v927_v42, 7 }
 0x47c   : > { %v1169_v47 = vpop.f32.mrb[10].mxu1 }
 0x47d   : > { %v2107_v48 = vpop.f32.mrb[11].mxu1  ;;  %1947 = vmatmul.mubr.msk.bf16.vlgmr.msra.gmra.mrb[4].mxu0 %vm1183_vm7, %v1172_v45  ;;  %v919_v45 = vld [vmem:[%s2657_s9] sm:$0x3]  ;;  %v929_v47 = vsub.s32 0, %v928_v44 }
 0x47e   : > { %2110 = vmatprep.mubr.msk.bf16.mxu0 %vm2239_vm3, %v2238_v43  ;;  %v2198_v43 = vld [vmem:[%s2661_s13] ss:$8 sps:$4 sm:$0xff]   ;;  %v920_v46 = vunpack.c.l.bf16 %v919_v45  ;;  %v933_v48 = vsub.s32 2, %v928_v44 }
 0x49a   : > { %v2064_v49 = vpop.f32.mrb[12].mxu1 }
 0x49b   : > { %v2065_v50 = vpop.f32.mrb[13].mxu1 }
 0x49c   : > { %v2066_v51 = vadd.f32 %v2065_v50, %v2064_v49  ;;  %v2067_v52 = vpop.f32.mrb[14].mxu1  ;;  %v930_v49 = vrot.slane %v920_v46, %v929_v47  ;;  %v934_v50 = vrot.slane %v920_v46, %v933_v48 }
 0x49d   : > { %v2068_v53 = vpop.f32.mrb[15].mxu1 }
 0x49e   : > { %v1411_v54 = vpack.c.bf16 %v2066_v51, %v2066_v51  ;;  %v924_v51 = vpop.permute.xlu1 %923  ;;  %v940_v52 = vrot.slane %v930_v49, %v929_v47  ;;  %v944_v53 = vrot.slane %v934_v50, %v929_v47 }
 0x4a0   : > { %v1416_v56 = vsel %vm875_vm4, %v1411_v54, 0  ;;  %v945_v54 = vmul.f32 %v940_v52, %v924_v51 }
 0x4a1   : > { %2109 = vmatpush3.bf16.msra.mxu0 %v1416_v56 }
 0x4a2   : > { %1474 = vmatprep.subr.bf16.mxu0 %v2200_v55  ;;  %v946_v55 = vmul.f32 %v944_v53, %v924_v51  ;;  %v655_v56 = vpop.permute.xlu1 %654 }
 0x4a4   : > { %2111 = vmatmul.mubr.msk.bf16.vlgmr.msra.gmra.mrb[16].mxu0 %vm871_vm5, %v1964_v57  ;;  %v2120_v57 = vadd.f32 %v945_v54, %v655_v56 }
 0x4a5   : > { %1475 = vmatpush1.bf16.msra.mxu0 %v2198_v43  ;;  %1506 = vmatprep.mubr.bf16.mxu0 %v2237_v1  ;;  %v2123_v43 = vadd.f32 %v946_v55, %v655_v56 }
 0x4a6   : > { %2072 = vmatprep.subr.bf16.mxu0 %v2201_v58 }
 0x577   : > { %v1452_v59 = vpop.f32.mrb[16].mxu0 }
 0x578   : > { %v1458_v61 = vpack.c.bf16 %v1452_v59, %v1452_v59  ;;  %v2112_v62 = vpop.f32.mrb[17].mxu0 }
 0x579   : > { %v1455_v0 = vpop.f32.mrb[18].mxu0 }
 0x57a   : > { %v2113_v3 = vpop.f32.mrb[19].mxu0  ;;  %1968 = vmatmul.mubr.msk.bf16.vlgmr.msra.gmra.mrb[4].mxu0 %vm542_vm0, %v1458_v61 }
 0x57b   : > { %2073 = vmatpush3.bf16.msra.mxu0 %v2202_v60  ;;  %1681 = vmatprep.mubr.bf16.mxu0 %v1550_v2 }
 0x57c   : > { %2074 = vmatprep.subr.bf16.mxu0 %v2203_v63 }
 0x57f   : > { %2075 = vmatpush3.bf16.msra.mxu0 %v2204_v4 }
 0x580   : > { %2076 = vmatprep.subr.bf16.mxu0 %v2205_v5 }
 0x583   : > { %2077 = vmatpush3.bf16.msra.mxu0 %v2206_v6 }
 0x584   : > { %2078 = vmatprep.subr.bf16.mxu0 %v2207_v40 }
 0x587   : > { %2079 = vmatpush3.bf16.msra.mxu0 %v2208_v7 }
 0x588   : > { %2080 = vmatprep.subr.bf16.mxu0 %v2209_v8 }
 0x58b   : > { %2081 = vmatpush3.bf16.msra.mxu0 %v2210_v9 }
 0x58c   : > { %2082 = vmatprep.subr.bf16.mxu0 %v2211_v10 }
 0x58f   : > { %2083 = vmatpush3.bf16.msra.mxu0 %v2212_v11 }
 0x590   : > { %2084 = vmatprep.subr.bf16.mxu0 %v2213_v12 }
 0x593   : > { %2085 = vmatpush3.bf16.msra.mxu0 %v2214_v13 }
 0x594   : > { %2086 = vmatprep.subr.bf16.mxu0 %v2215_v14 }
 0x597   : > { %2087 = vmatpush3.bf16.msra.mxu0 %v2216_v15 }
 0x59a   : > { %1682 = vmatmul.mubr.bf16.vlgmr.msra.gmra.mrb[20].mxu0 %v1549_v16 }
 0x64d   : > { %v1508_v17 = vpop.f32.mrb[4].mxu0 }
 0x64e   : > { %v1510_v18 = vpop.f32.mrb[5].mxu0  ;;  %v2121_v58 = vadd.f32 %v2120_v57, %v1508_v17 }
 0x64f   : > { %v1512_v19 = vpop.f32.mrb[6].mxu0  ;;  %v2124_v59 = vadd.f32 %v2123_v43, %v1510_v18 }
 0x650   : > { %v1513_v20 = vpop.f32.mrb[7].mxu0 }
 0x66d   : > { %v2088_v21 = vpop.f32.mrb[20].mxu0 }
 0x66e   : > { %v2089_v22 = vpop.f32.mrb[21].mxu0 }
 0x66f   : > { %v2090_v23 = vadd.f32 %v2089_v22, %v2088_v21  ;;  %v2091_v24 = vpop.f32.mrb[22].mxu0 }
 0x670   : > { %v2092_v25 = vpop.f32.mrb[23].mxu0 }
 0x671   : > { %v1691_v26 = vpack.c.bf16 %v2090_v23, %v2090_v23 }
 0x673   : > { %v1696_v28 = vsel %vm875_vm4, %v1691_v26, 0 }
 0x674   : > { %2115 = vmatpush3.bf16.msra.mxu1 %v1696_v28 }
 0x675   : > { %1791 = vmatprep.subr.bf16.mxu1 %v2219_v27 }
 0x677   : > { %2117 = vmatmul.mubr.msk.bf16.vlgmr.msra.gmra.mrb[16].mxu1 %vm871_vm5, %v1985_v41 }
 0x678   : > { %1792 = vmatpush1.bf16.msra.mxu1 %v2217_v29  ;;  %1823 = vmatprep.mubr.bf16.mxu1 %v2237_v1  ;;  %v2226_v1 = vld [vmem:[%s2663_s15 + $0x30] ss:$8 sps:$4 sm:$0xff]  }
 0x679   : > { %1793 = vmatprep.subr.bf16.mxu1 %v2222_v30 }
 0x67c   : > { %1794 = vmatpush1.bf16.msra.mxu1 %v2220_v31 }
 0x67d   : > { %1795 = vmatprep.subr.bf16.mxu1 %v2225_v32 }
 0x680   : > { %1796 = vmatpush1.bf16.msra.mxu1 %v2223_v33 }
 0x681   : > { %1797 = vmatprep.subr.bf16.mxu1 %v2228_v34 }
 0x684   : > { %1798 = vmatpush1.bf16.msra.mxu1 %v2226_v1 }
 0x74a   : > { %v1732_v35 = vpop.f32.mrb[16].mxu1 }
 0x74b   : > { %v1738_v36 = vpack.c.bf16 %v1732_v35, %v1732_v35  ;;  %v2118_v37 = vpop.f32.mrb[17].mxu1 }
 0x74c   : > { %v1735_v38 = vpop.f32.mrb[18].mxu1 }
 0x74d   : > { %1995 = vmatmul.mubr.msk.bf16.vlgmr.msra.gmra.mrb[20].mxu1 %vm1787_vm8, %v1738_v36  ;;  %v2119_v39 = vpop.f32.mrb[19].mxu1 }
 0x820   : > { %v1825_v60 = vpop.f32.mrb[20].mxu1 }
 0x821   : > { %v2122_v61 = vadd.f32 %v2121_v58, %v1825_v60  ;;  %v1827_v62 = vpop.f32.mrb[21].mxu1 }
 0x822   : > { %v2125_v63 = vadd.f32 %v2124_v59, %v1827_v62  ;;  %v1829_v0 = vpop.f32.mrb[22].mxu1 }
 0x823   : > { %v1830_v2 = vpop.f32.mrb[23].mxu1 }
 0x824   : > { %v1836_v3 = vcombine.low %v2122_v61, %v2125_v63 }
 0x826   : > { %1838 = vst [vmem:[%s521_s19] sm:$0xff] %v1836_v3 }
 0x827 PF: > { %s26_s21 = sadd.s32 1, %s2235_s21  }
 0x828   : > { %p23_p4 = scmp.ge.s32.totalorder %s26_s21, 4  }
 0x82a   :  { %25 = sbr.rel (!%p23_p4) target bundleno = 2 (0x2), region = 117 }

</bundles_post_ra>
